<compile_context>
chip_gen: v6e
topology: v6e:2x2x1
jax: 0.10.0
libtpu: 0.0.40
codegen_flags: <defaults>
</compile_context>

<pallas_src>
import functools

import jax
import jax.numpy as jnp
from jax.experimental import pallas as pl
from jax.experimental.pallas import tpu as pltpu


def _round_up(x, m):
    return ((x + m - 1) // m) * m


def decoder_kernel(z_ref, w1_ref, b1_ref, w2_ref, b2_ref, out_ref):
    # fc1 + LeakyReLU (negative_slope = 0.01, PyTorch default)
    h = jnp.dot(z_ref[...], w1_ref[...], preferred_element_type=jnp.float32)
    h = h + b1_ref[...]
    h = jnp.where(h >= 0.0, h, 0.01 * h)

    # fc2 + Sigmoid; output written at its natural width (784): 6 dense
    # 128-lane chunks + one masked 16-lane tail — no padded columns, no
    # post-kernel slice pass.
    o = jnp.dot(h, w2_ref[...], preferred_element_type=jnp.float32)
    o = o + b2_ref[...]
    out_ref[...] = jax.nn.sigmoid(o).astype(out_ref.dtype)


def _pick_batch_tile(B, block_b):
    """Pick (tile, padded_batch, n_steps).

    - tile is always a multiple of 8 (sublane constraint) and <= block_b.
    - at least min(4, cdiv(B, 8)) grid steps so the pipeline has overlap and
      v7x's 2 TensorCores both get work.
    - tile is re-balanced across the chosen step count so ragged batches
      don't pad up to a full fixed tile.
    """
    block_b = max(8, _round_up(block_b, 8))
    n_steps = max(pl.cdiv(B, block_b), min(4, pl.cdiv(B, 8)))
    tb = _round_up(pl.cdiv(B, n_steps), 8)
    b_pad = _round_up(B, tb)
    return tb, b_pad, b_pad // tb


@functools.partial(jax.jit, static_argnames=("block_b",))
def decoder_forward(z, w1, b1, w2, b2, *, block_b=2048):
    """z: [B, z_dim]; w1: [z_dim, H]; b1: [1, H]; w2: [H, 784]; b2: [1, 784]."""
    B, z_dim = z.shape
    H = w1.shape[1]
    out_dim = w2.shape[1]

    tb, b_pad, n_steps = _pick_batch_tile(B, block_b)
    if b_pad != B:
        z = jnp.pad(z, ((0, b_pad - B), (0, 0)))

    grid = (n_steps,)

    # Cost estimate for XLA's scheduler (real, unpadded traffic).
    flops = 2 * b_pad * (z_dim * H + H * out_dim)
    bytes_accessed = 4 * (
        b_pad * z_dim + b_pad * out_dim          # activations in / out
        + z_dim * H + H + H * out_dim + out_dim  # weights + biases
    )

    # VMEM budget: double-buffered z/out tiles + (possibly double-buffered)
    # resident weights, plus headroom.  Cap at v7x's 64 MiB physical VMEM.
    tile_bytes = 4 * tb * (z_dim + out_dim)
    weight_bytes = 4 * (z_dim * H + H + H * out_dim + out_dim)
    vmem_limit = int(min(64 << 20, max(2 * tile_bytes + 2 * weight_bytes + (4 << 20),
                                       16 << 20)))

    out = pl.pallas_call(
        decoder_kernel,
        out_shape=jax.ShapeDtypeStruct((b_pad, out_dim), jnp.float32),
        grid=grid,
        in_specs=[
            pl.BlockSpec((tb, z_dim), lambda i: (i, 0)),   # batch-tiled activations
            pl.BlockSpec((z_dim, H), lambda i: (0, 0)),    # weights: VMEM-resident
            pl.BlockSpec((1, H), lambda i: (0, 0)),
            pl.BlockSpec((H, out_dim), lambda i: (0, 0)),
            pl.BlockSpec((1, out_dim), lambda i: (0, 0)),
        ],
        out_specs=pl.BlockSpec((tb, out_dim), lambda i: (i, 0)),
        compiler_params=pltpu.CompilerParams(
            dimension_semantics=("parallel",),             # shards across v7x's 2 TCs
            vmem_limit_bytes=vmem_limit,
        ),
        cost_estimate=pl.CostEstimate(
            flops=flops,
            transcendentals=b_pad * out_dim,               # sigmoid exp per element
            bytes_accessed=bytes_accessed,
        ),
    )(z, w1, b1, w2, b2)

    # Only strip batch padding when it was actually added (no lane-dim slice).
    if b_pad != B:
        out = out[:B]
    return out


def init_params(key, z_dim, hidden_dim, out_dim=784):
    """Deterministic init mimicking nn.Linear's U(-1/sqrt(fan_in), 1/sqrt(fan_in))."""
    k1, k2, k3, k4 = jax.random.split(key, 4)
    bound1 = 1.0 / jnp.sqrt(z_dim)
    bound2 = 1.0 / jnp.sqrt(hidden_dim)
    w1 = jax.random.uniform(k1, (z_dim, hidden_dim), jnp.float32, -bound1, bound1)
    b1 = jax.random.uniform(k2, (1, hidden_dim), jnp.float32, -bound1, bound1)
    w2 = jax.random.uniform(k3, (hidden_dim, out_dim), jnp.float32, -bound2, bound2)
    b2 = jax.random.uniform(k4, (1, out_dim), jnp.float32, -bound2, bound2)
    return w1, b1, w2, b2


def reference_forward(z, w1, b1, w2, b2):
    h = z @ w1 + b1
    h = jnp.where(h >= 0.0, h, 0.01 * h)
    return jax.nn.sigmoid(h @ w2 + b2)


if __name__ == "__main__":
    key = jax.random.PRNGKey(0)
    k_z, k_z2, k_p = jax.random.split(key, 3)

    z_dim, hidden_dim = 8, 32
    w1, b1, w2, b2 = init_params(k_p, z_dim, hidden_dim)

    # Small demo shape (single grid step).
    batch = 8
    z = jax.random.normal(k_z, (batch, z_dim), jnp.float32)
    out = jax.block_until_ready(decoder_forward(z, w1, b1, w2, b2))
    ref = reference_forward(z, w1, b1, w2, b2)
    assert out.shape == (batch, 784)
    assert jnp.allclose(out, ref, atol=1e-5, rtol=1e-5), "mismatch vs reference (B=8)"

    # Exercise the multi-step / ragged-batch path (adaptive tile + padding).
    batch2 = 260
    z2 = jax.random.normal(k_z2, (batch2, z_dim), jnp.float32)
    out2 = jax.block_until_ready(decoder_forward(z2, w1, b1, w2, b2, block_b=128))
    ref2 = reference_forward(z2, w1, b1, w2, b2)
    assert out2.shape == (batch2, 784)
    assert jnp.allclose(out2, ref2, atol=1e-5, rtol=1e-5), "mismatch vs reference (B=260)"

    print("KERNEL_OK")
</pallas_src>

<mosaic_0001>
module attributes {stable_mosaic.version = 11 : i64} {
  func.func @decoder_kernel(%arg0: i32, %arg1: memref<8x8xf32, #tpu.memory_space<vmem>>, %arg2: memref<8x32xf32, #tpu.memory_space<vmem>>, %arg3: memref<1x32xf32, #tpu.memory_space<vmem>>, %arg4: memref<32x784xf32, #tpu.memory_space<vmem>>, %arg5: memref<1x784xf32, #tpu.memory_space<vmem>>, %arg6: memref<8x784xf32, #tpu.memory_space<vmem>>) attributes {dimension_semantics = [#tpu.dimension_semantics<parallel>], iteration_bounds = array<i64: 1>, scalar_prefetch = 0 : i64, scratch_operands = 0 : i64, tpu.core_type = #tpu.core_type<tc>, window_params = [{transform_indices = @transform_0, window_bounds = array<i64: 8, 8>}, {pipeline_mode = #tpu.pipeline_mode<synchronous>, transform_indices = @transform_1, window_bounds = array<i64: 8, 32>}, {pipeline_mode = #tpu.pipeline_mode<synchronous>, transform_indices = @transform_2, window_bounds = array<i64: 1, 32>}, {pipeline_mode = #tpu.pipeline_mode<synchronous>, transform_indices = @transform_3, window_bounds = array<i64: 32, 784>}, {pipeline_mode = #tpu.pipeline_mode<synchronous>, transform_indices = @transform_4, window_bounds = array<i64: 1, 784>}, {transform_indices = @transform_5, window_bounds = array<i64: 8, 784>}]} {
    %c0 = arith.constant 0 : index
    %c0_0 = arith.constant 0 : index
    %0 = vector.load %arg1[%c0, %c0_0] : memref<8x8xf32, #tpu.memory_space<vmem>>, vector<8x8xf32>
    %c0_1 = arith.constant 0 : index
    %c0_2 = arith.constant 0 : index
    %1 = vector.load %arg2[%c0_1, %c0_2] : memref<8x32xf32, #tpu.memory_space<vmem>>, vector<8x32xf32>
    %cst = arith.constant dense<0.000000e+00> : vector<8x32xf32>
    %2 = tpu.matmul %0, %1, %cst {dimension_numbers = #tpu.dot_dimension_numbers<[1], [0], [0], [1], [0, 0, 1, 1], [], []>} : vector<8x8xf32>, vector<8x32xf32>, vector<8x32xf32> -> vector<8x32xf32>
    %c0_3 = arith.constant 0 : index
    %c0_4 = arith.constant 0 : index
    %3 = vector.load %arg3[%c0_3, %c0_4] : memref<1x32xf32, #tpu.memory_space<vmem>>, vector<1x32xf32>
    %4 = vector.broadcast %3 : vector<1x32xf32> to vector<8x32xf32>
    %5 = arith.addf %2, %4 : vector<8x32xf32>
    %cst_5 = arith.constant 0.000000e+00 : f32
    %6 = vector.broadcast %cst_5 : f32 to vector<8x32xf32>
    %7 = arith.cmpf oge, %5, %6 : vector<8x32xf32>
    %cst_6 = arith.constant 0.00999999977 : f32
    %8 = vector.broadcast %cst_6 : f32 to vector<8x32xf32>
    %9 = arith.mulf %8, %5 : vector<8x32xf32>
    %10 = arith.select %7, %5, %9 : vector<8x32xi1>, vector<8x32xf32>
    %c0_7 = arith.constant 0 : index
    %c0_8 = arith.constant 0 : index
    %11 = vector.load %arg4[%c0_7, %c0_8] : memref<32x784xf32, #tpu.memory_space<vmem>>, vector<32x784xf32>
    %cst_9 = arith.constant dense<0.000000e+00> : vector<8x784xf32>
    %12 = tpu.matmul %10, %11, %cst_9 {dimension_numbers = #tpu.dot_dimension_numbers<[1], [0], [0], [1], [0, 0, 1, 1], [], []>} : vector<8x32xf32>, vector<32x784xf32>, vector<8x784xf32> -> vector<8x784xf32>
    %c0_10 = arith.constant 0 : index
    %c0_11 = arith.constant 0 : index
    %13 = vector.load %arg5[%c0_10, %c0_11] : memref<1x784xf32, #tpu.memory_space<vmem>>, vector<1x784xf32>
    %14 = vector.broadcast %13 : vector<1x784xf32> to vector<8x784xf32>
    %15 = arith.addf %12, %14 : vector<8x784xf32>
    %16 = arith.negf %15 : vector<8x784xf32>
    %17 = math.exp %16 : vector<8x784xf32>
    %cst_12 = arith.constant 1.000000e+00 : f32
    %18 = vector.broadcast %cst_12 : f32 to vector<8x784xf32>
    %19 = arith.addf %18, %17 : vector<8x784xf32>
    %20 = arith.divf %18, %19 : vector<8x784xf32>
    %c0_13 = arith.constant 0 : index
    %c0_14 = arith.constant 0 : index
    %21 = vector.load %arg6[%c0_13, %c0_14] : memref<8x784xf32, #tpu.memory_space<vmem>>, vector<8x784xf32>
    tpu.vector_store %arg6[%c0_13, %c0_14], %20 {strides = array<i32>} : memref<8x784xf32, #tpu.memory_space<vmem>>, vector<8x784xf32>,
    return
  }
  func.func @transform_0(%arg0: i32) -> (i32, i32) {
    %c0_i32 = arith.constant 0 : i32
    %c0_i32_0 = arith.constant 0 : i32
    return %arg0, %c0_i32 : i32, i32
  }
  func.func @transform_1(%arg0: i32) -> (i32, i32) {
    %c0_i32 = arith.constant 0 : i32
    %c0_i32_0 = arith.constant 0 : i32
    %c0_i32_1 = arith.constant 0 : i32
    return %c0_i32, %c0_i32_0 : i32, i32
  }
  func.func @transform_2(%arg0: i32) -> (i32, i32) {
    %c0_i32 = arith.constant 0 : i32
    %c0_i32_0 = arith.constant 0 : i32
    %c0_i32_1 = arith.constant 0 : i32
    return %c0_i32, %c0_i32_0 : i32, i32
  }
  func.func @transform_3(%arg0: i32) -> (i32, i32) {
    %c0_i32 = arith.constant 0 : i32
    %c0_i32_0 = arith.constant 0 : i32
    %c0_i32_1 = arith.constant 0 : i32
    return %c0_i32, %c0_i32_0 : i32, i32
  }
  func.func @transform_4(%arg0: i32) -> (i32, i32) {
    %c0_i32 = arith.constant 0 : i32
    %c0_i32_0 = arith.constant 0 : i32
    %c0_i32_1 = arith.constant 0 : i32
    return %c0_i32, %c0_i32_0 : i32, i32
  }
  func.func @transform_5(%arg0: i32) -> (i32, i32) {
    %c0_i32 = arith.constant 0 : i32
    %c0_i32_0 = arith.constant 0 : i32
    return %arg0, %c0_i32 : i32, i32
  }
}

</mosaic_0001>

<bundles_post_ra>
// kernel: decoder_forward.1
= control target key start
LH: loop header
LB: loop body
LE: loop exit
PB: predicated region body
PF: predicated region fallthrough
CT: control target
= control target key end

     0   :  { %10 = vsyncpa [#allocation3], 0  ;;  %s829_s0 = inlined_call_operand.hbm [shape: f32[8,8], index: 0, kind: input, shape index: {}]   ;;  %s830_s1 = inlined_call_operand.hbm [shape: f32[8,32], index: 1, kind: input, shape index: {}]   ;;  %s831_s2 = inlined_call_operand.hbm [shape: f32[1,32], index: 2, kind: input, shape index: {}]   ;;  %s832_s3 = inlined_call_operand.hbm [shape: f32[32,784], index: 3, kind: input, shape index: {}]   ;;  %s833_s4 = inlined_call_operand.vmem [shape: f32[1,784], index: 4, kind: input, shape index: {}]   ;;  %s834_s5 = inlined_call_operand.hbm [shape: f32[8,784], index: 5, kind: output, shape index: {}]  }
   0x1   :  { %11 = vsyncpa [#allocation6], 0 }
   0x2   :  { %12 = vsyncpa [#allocation9], 0 }
   0x3   :  { %13 = vsyncpa [#allocation4], 0  ;;  %s756_s18 = smov [#allocation5]   ;;  %s757_s20 = smov [#allocation2]  }
   0x4   :  { %s30_s19 = sshll.u32 %s756_s18, 4  ;;  %s20_s21 = sshll.u32 %s757_s20, 4  ;;  %s31_s19 = int_to_ptr.vmem [resolvable:$true] %s30_s19  ;;  %s21_s21 = int_to_ptr.vmem [resolvable:$true] %s20_s21 }
   0x5   :  { %s656_s22 = scalar_lea.vmem %s31_s19, 128  ;;  %p661_p1 = scmp.lt.s32.totalorder %s31_s19, %s31_s19 }
   0x6   :  { %p657_p0 = scmp.ne.s32.totalorder %s31_s19, %s656_s22  ;;  %p662_p2 = scmp.lt.s32.totalorder %s656_s22, %s656_s22 }
   0x8   :  { %p663_p3 = por %p662_p2, %p661_p1 }
   0xa   :  { %p664_p4 = pnand %p663_p3, %p657_p0 }
   0xc   :  { %667 = shalt.err (!%p664_p4)
}
   0xd   :  { %33 = dma.hbm_to_vmem [thread:$0]  %s830_s1, 128, %s31_s19, [#allocation6]  }
   0xe   :  { %s676_s25 = scalar_lea.vmem %s21_s21, 128  ;;  %p681_p6 = scmp.lt.s32.totalorder %s21_s21, %s21_s21 }
   0xf   :  { %p677_p5 = scmp.ne.s32.totalorder %s21_s21, %s676_s25  ;;  %p682_p7 = scmp.lt.s32.totalorder %s676_s25, %s676_s25 }
  0x11   :  { %p683_p8 = por %p682_p7, %p681_p6 }
  0x13   :  { %p684_p9 = pnand %p683_p8, %p677_p5 }
  0x15   :  { %687 = shalt.err (!%p684_p9)
}
  0x16   :  { %23 = dma.hbm_to_vmem [thread:$0]  %s829_s0, 128, %s21_s21, [#allocation3]  }
  0x17   :  { %s758_s28 = smov [#allocation7]   ;;  %s759_s30 = smov [#allocation8]  }
  0x18   :  { %s40_s29 = sshll.u32 %s758_s28, 4  ;;  %s49_s6 = sshll.u32 %s759_s30, 4  ;;  %s41_s29 = int_to_ptr.vmem [resolvable:$true] %s40_s29  ;;  %s50_s6 = int_to_ptr.vmem [resolvable:$true] %s49_s6 }
  0x19   :  { %s696_s7 = scalar_lea.vmem %s41_s29, 16  ;;  %s700_s1 = scalar_lea.vmem %s41_s29, 32 }
  0x1a   :  { %p697_p10 = scmp.ne.s32.totalorder %s41_s29, %s696_s7  ;;  %p701_p11 = scmp.lt.s32.totalorder %s41_s29, %s41_s29 }
  0x1b   :  { %p702_p12 = scmp.lt.s32.totalorder %s700_s1, %s696_s7 }
  0x1d   :  { %p703_p13 = por %p702_p12, %p701_p11 }
  0x1f   :  { %p704_p0 = pnand %p703_p13, %p697_p10 }
  0x21   :  { %707 = shalt.err (!%p704_p0)
}
  0x22   :  { %43 = dma.hbm_to_vmem [thread:$0]  %s831_s2, 16, %s41_s29, [#allocation6]  }
  0x23   :  { %s716_s10 = scalar_lea.vmem %s50_s6, 3584  ;;  %p721_p2 = scmp.lt.s32.totalorder %s50_s6, %s50_s6 }
  0x24   :  { %p717_p1 = scmp.ne.s32.totalorder %s50_s6, %s716_s10  ;;  %p722_p3 = scmp.lt.s32.totalorder %s716_s10, %s716_s10 }
  0x26   :  { %p723_p4 = por %p722_p3, %p721_p2 }
  0x28   :  { %p724_p5 = pnand %p723_p4, %p717_p1 }
  0x2a   :  { %727 = shalt.err (!%p724_p5)
}
  0x2b   :  { %s760_s0 = smov 896   ;;  %s761_s11 = smov 56  }
  0x2c   :  { %55 = dma.hbm_to_vmem [thread:$0]  %s832_s3, 3584, %s50_s6, [#allocation9], %s760_s0, %s760_s0, %s761_s11  }
  0x2d   :  { %748 = dma.done.wait [#allocation3], 128  }
  0x2e   :  { %749 = vsyncadd [#allocation3], 4294967168 }
  0x2f   :  { %750 = dma.done.wait [#allocation6], 144  }
  0x30   :  { %751 = vsyncadd [#allocation6], 4294967152 }
  0x31   :  { %752 = dma.done.wait [#allocation9], 3584  }
  0x32   :  { %753 = vsyncadd [#allocation9], 4294963712  ;;  %v762_v0 = vmov 0.0   ;;  %vm763_vm0 = vmmov 0   ;;  %vm79_vm1 = vcmask 64512   ;;  %v71_v1 = vld [vmem:[#allocation5] sm:$0xff]  ;;  %v186_v37 = vlaneseq }
  0x33   :  { %595 = vmatprep.subr.mxu0 %v762_v0  ;;  %597 = vmatprep.mubr.msk.f32.mxu0 %vm763_vm0, %v762_v0  ;;  %v70_v2 = vld [vmem:[#allocation2] sm:$0xff]  ;;  %v180_v4 = vld [vmem:[#allocation8 + $0xc0] sm:$0xff]  ;;  %v179_v6 = vld [vmem:[#allocation8 + $0xb8] sm:$0xff]  ;;  %vm221_vm3 = vcmask 261120   ;;  %vm556_vm4 = vcmask 130048  }
  0x34   :  { %289 = vmatprep.mubr.f32.mxu1 %v762_v0  ;;  %v178_v3 = vld [vmem:[#allocation8 + $0xb0] sm:$0xff]  ;;  %596 = vmatpush3.msra.mxu0 %v71_v1  ;;  %v177_v5 = vld [vmem:[#allocation8 + $0xa8] sm:$0xff]  ;;  %v171_v7 = vld [vmem:[#allocation8 + $0x78] sm:$0xff]  ;;  %v187_v38 = vshrl.u32 %v186_v37, 7 }
  0x35   :  { %249 = vmatprep.subr.mxu1 %v178_v3  ;;  %598 = vmatmul.mubr.msk.f32.vlgmr.msra.gmra.mxu0 %vm79_vm1, %v70_v2  ;;  %v173_v8 = vld [vmem:[#allocation8 + $0x88] sm:$0xff]  ;;  %v170_v9 = vld [vmem:[#allocation8 + $0x70] sm:$0xff]  ;;  %v172_v10 = vld [vmem:[#allocation8 + $0x80] sm:$0xff] }
  0x36   :  { %320 = vmatprep.subr.mxu0 %v180_v4  ;;  %250 = vmatpush1.msra.mxu1 %v177_v5  ;;  %v164_v11 = vld [vmem:[#allocation8 + $0x40] sm:$0xff]  ;;  %v166_v12 = vld [vmem:[#allocation8 + $0x50] sm:$0xff]  ;;  %v163_v13 = vld [vmem:[#allocation8 + $0x38] sm:$0xff]  ;;  %v188_v39 = vsub.s32 0, %v187_v38  ;;  %v196_v40 = vsub.s32 2, %v187_v38  ;;  %v192_v42 = vsub.s32 1, %v187_v38 }
  0x37   :  { %321 = vmatpush1.msra.mxu0 %v179_v6  ;;  %251 = vmatprep.subr.mxu1 %v171_v7  ;;  %v165_v14 = vld [vmem:[#allocation8 + $0x48] sm:$0xff]  ;;  %v159_v16 = vld [vmem:[#allocation8 + $0x18] sm:$0xff]  ;;  %v156_v17 = vld [vmem:[#allocation8] sm:$0xff]  ;;  %v200_v43 = vsub.s32 3, %v187_v38  ;;  %v204_v54 = vsub.s32 4, %v187_v38  ;;  %v212_v55 = vsub.s32 6, %v187_v38 }
  0x38   :  { %322 = vmatprep.subr.mxu0 %v173_v8  ;;  %360 = vmatprep.mubr.f32.mxu0 %v762_v0  ;;  %v157_v15 = vld [vmem:[#allocation8 + $0x8] sm:$0xff]  ;;  %v158_v18 = vld [vmem:[#allocation8 + $0x10] sm:$0xff]  ;;  %v575_v20 = vld [vmem:[#allocation7] ss:$0 sm:$0xff]  ;;  %v208_v60 = vsub.s32 5, %v187_v38 }
  0x39   :  { %252 = vmatpush1.msra.mxu1 %v170_v9  ;;  %323 = vmatpush1.msra.mxu0 %v172_v10  ;;  %v182_v19 = vld [vmem:[#allocation8 + $0xd0] sm:$0xff]  ;;  %v181_v25 = vld [vmem:[#allocation8 + $0xc8] sm:$0xff]  ;;  %v183_v26 = vld [vmem:[#allocation8 + $0xd8] sm:$0xff] }
  0x3a   :  { %253 = vmatprep.subr.mxu1 %v164_v11  ;;  %324 = vmatprep.subr.mxu0 %v166_v12  ;;  %v175_v28 = vld [vmem:[#allocation8 + $0x98] sm:$0xff]  ;;  %v174_v29 = vld [vmem:[#allocation8 + $0x90] sm:$0xff]  ;;  %v176_v30 = vld [vmem:[#allocation8 + $0xa0] sm:$0xff] }
  0x3b   :  { %254 = vmatpush1.msra.mxu1 %v163_v13  ;;  %325 = vmatpush1.msra.mxu0 %v165_v14  ;;  %v168_v31 = vld [vmem:[#allocation8 + $0x60] sm:$0xff]  ;;  %v167_v32 = vld [vmem:[#allocation8 + $0x58] sm:$0xff]  ;;  %v169_v33 = vld [vmem:[#allocation8 + $0x68] sm:$0xff] }
  0x3c   :  { %255 = vmatprep.subr.mxu1 %v157_v15  ;;  %326 = vmatprep.subr.mxu0 %v159_v16  ;;  %v161_v34 = vld [vmem:[#allocation8 + $0x28] sm:$0xff]  ;;  %v160_v35 = vld [vmem:[#allocation8 + $0x20] sm:$0xff]  ;;  %v162_v36 = vld [vmem:[#allocation8 + $0x30] sm:$0xff] }
  0x3d   :  { %256 = vmatpush1.msra.mxu1 %v156_v17  ;;  %327 = vmatpush1.msra.mxu0 %v158_v18  ;;  %v184_v41 = vld [vmem:[%s833_s4] sm:$0x7f]  ;;  %s764_s4 = smov [#allocation10]  }
  0x3e   :  { %391 = vmatprep.subr.mxu1 %v182_v19  ;;  %600 = vmatprep.subr.mxu0 %v762_v0  ;;  %v189_v44 = vrot.slane %v184_v41, %v188_v39  ;;  %v197_v45 = vrot.slane %v184_v41, %v196_v40  ;;  %v193_v46 = vrot.slane %v184_v41, %v192_v42  ;;  %s564_s14 = sshll.u32 %s764_s4, 4  ;;  %s565_s14 = int_to_ptr.vmem [resolvable:$true] %s564_s14 }
  0x3f   :  { %v201_v47 = vrot.slane %v184_v41, %v200_v43  ;;  %v205_v63 = vrot.slane %v184_v41, %v204_v54  ;;  %v209_v1 = vrot.slane %v184_v41, %v208_v60  ;;  %s728_s15 = scalar_lea.vmem %s565_s14, 896  ;;  %p733_p7 = scmp.lt.s32.totalorder %s565_s14, %s565_s14 }
  0x40   :  { %p729_p6 = scmp.ne.s32.totalorder %s565_s14, %s728_s15  ;;  %p734_p8 = scmp.lt.s32.totalorder %s728_s15, %s728_s15 }
  0x42   :  { %p735_p9 = por %p734_p8, %p733_p7 }
  0x44   :  { %p736_p10 = pnand %p735_p9, %p729_p6 }
  0xf5   :  { %v149_v21 = vpop.f32.mrf.mxu0 }
  0xf6   :  { %v150_v22 = vadd.f32 %v575_v20, %v149_v21 }
  0xf7   :  { %v599_v23 = vpop.f32.mrf.mxu0 }
  0xf8   :  { %vm153_vm2 = vcmp.ge.f32.partialorder %v150_v22, 0.0  ;;  %v154_v24 = vmul.f32 0.01, %v150_v22 }
  0xfa   :  { %v155_v27 = vsel %vm153_vm2, %v150_v22, %v154_v24 }
  0xfb   :  { %577 = vmatmul.mubr.msk.f32.vlgmr.msra.gmra.mxu1 %vm221_vm3, %v155_v27  ;;  %578 = vmatmul.mubr.msk.f32.vlgmr.msra.gmra.mxu0 %vm221_vm3, %v155_v27 }
  0xfc   :  { %392 = vmatpush1.msra.mxu1 %v181_v25  ;;  %601 = vmatpush3.msra.mxu0 %v183_v26 }
  0xfd   :  { %393 = vmatprep.subr.mxu1 %v175_v28  ;;  %602 = vmatprep.subr.mxu0 %v762_v0 }
  0xfe   :  { %394 = vmatpush1.msra.mxu1 %v174_v29  ;;  %603 = vmatpush3.msra.mxu0 %v176_v30 }
  0xff   :  { %395 = vmatprep.subr.mxu1 %v168_v31  ;;  %604 = vmatprep.subr.mxu0 %v762_v0 }
 0x100   :  { %396 = vmatpush1.msra.mxu1 %v167_v32  ;;  %605 = vmatpush3.msra.mxu0 %v169_v33 }
 0x101   :  { %397 = vmatprep.subr.mxu1 %v161_v34  ;;  %606 = vmatprep.subr.mxu0 %v762_v0 }
 0x102   :  { %398 = vmatpush1.msra.mxu1 %v160_v35  ;;  %431 = vmatprep.mubr.f32.mxu1 %v762_v0 }
 0x103   :  { %607 = vmatpush3.msra.mxu0 %v162_v36  ;;  %608 = vmatprep.mubr.msk.f32.mxu0 %vm763_vm0, %v762_v0  ;;  %v213_v0 = vrot.slane %v184_v41, %v212_v55 }
 0x104   :  { %579 = vmatmul.mubr.msk.f32.vlgmr.msra.gmra.mxu1 %vm221_vm3, %v155_v27  ;;  %609 = vmatmul.mubr.msk.f32.vlgmr.msra.gmra.mxu0 %vm221_vm3, %v155_v27 }
 0x1bb   :  { %v291_v48 = vpop.f32.mrf.mxu1  ;;  %v362_v49 = vpop.f32.mrf.mxu0 }
 0x1bc   :  { %v292_v50 = vadd.f32 %v291_v48, %v189_v44  ;;  %v363_v51 = vadd.f32 %v362_v49, %v197_v45 }
 0x1bd   :  { %v293_v52 = vpop.f32.mrf.mxu1  ;;  %v364_v53 = vpop.f32.mrf.mxu0 }
 0x1be   :  { %v581_v56 = vmul.f32 -1.442695, %v292_v50  ;;  %v583_v57 = vmul.f32 -1.442695, %v363_v51  ;;  %v294_v58 = vadd.f32 %v293_v52, %v193_v46  ;;  %v365_v59 = vadd.f32 %v364_v53, %v201_v47 }
 0x1c0   :  { %620 = vpow2.f32 %v581_v56  ;;  %v582_v61 = vmul.f32 -1.442695, %v294_v58  ;;  %v584_v62 = vmul.f32 -1.442695, %v365_v59 }
 0x1c1   :  { %622 = vpow2.f32 %v583_v57 }
 0x1c2   :  { %624 = vpow2.f32 %v582_v61 }
 0x1c3   :  { %626 = vpow2.f32 %v584_v62 }
 0x1c4   :  { %v433_v2 = vpop.f32.mrf.mxu1  ;;  %v504_v3 = vpop.f32.mrf.mxu0 }
 0x1c5   :  { %v434_v4 = vadd.f32 %v433_v2, %v205_v63  ;;  %v505_v5 = vadd.f32 %v504_v3, %v213_v0 }
 0x1c6   :  { %v435_v6 = vpop.f32.mrf.mxu1  ;;  %v610_v7 = vpop.f32.mrf.mxu0 }
 0x1c7   :  { %v585_v8 = vmul.f32 -1.442695, %v434_v4  ;;  %v587_v9 = vmul.f32 -1.442695, %v505_v5  ;;  %v436_v10 = vadd.f32 %v435_v6, %v209_v1 }
 0x1c9   :  { %628 = vpow2.f32 %v585_v8  ;;  %v586_v11 = vmul.f32 -1.442695, %v436_v10 }
 0x1ca   :  { %630 = vpow2.f32 %v587_v9 }
 0x1cb   :  { %632 = vpow2.f32 %v586_v11 }
 0x1cd   :  { %v621_v12 = vpop.eup %620 }
 0x1ce   :  { %v623_v13 = vpop.eup %622  ;;  %v529_v14 = vadd.f32 1.0, %v621_v12 }
 0x1cf   :  { %v625_v15 = vpop.eup %624  ;;  %v531_v16 = vadd.f32 1.0, %v623_v13 }
 0x1d0   :  { %v627_v17 = vpop.eup %626  ;;  %634 = vrcp.f32 %v529_v14  ;;  %v530_v18 = vadd.f32 1.0, %v625_v15 }
 0x1d1   :  { %636 = vrcp.f32 %v531_v16  ;;  %v532_v19 = vadd.f32 1.0, %v627_v17 }
 0x1d2   :  { %638 = vrcp.f32 %v530_v18 }
 0x1d3   :  { %640 = vrcp.f32 %v532_v19 }
 0x1d6   :  { %v629_v20 = vpop.eup %628 }
 0x1d7   :  { %v631_v21 = vpop.eup %630  ;;  %v533_v22 = vadd.f32 1.0, %v629_v20 }
 0x1d8   :  { %v633_v23 = vpop.eup %632  ;;  %v535_v24 = vadd.f32 1.0, %v631_v21 }
 0x1d9   :  { %642 = vrcp.f32 %v533_v22  ;;  %v534_v25 = vadd.f32 1.0, %v633_v23 }
 0x1da   :  { %644 = vrcp.f32 %v535_v24 }
 0x1db   :  { %646 = vrcp.f32 %v534_v25 }
 0x1dd   :  { %v635_v26 = vpop.eup %634 }
 0x1de   :  { %v637_v27 = vpop.eup %636  ;;  %550 = vst [vmem:[#allocation10] sm:$0xff] %v635_v26 }
 0x1df   :  { %v639_v28 = vpop.eup %638  ;;  %552 = vst [vmem:[#allocation10 + $0x10] sm:$0xff] %v637_v27 }
 0x1e0   :  { %v641_v29 = vpop.eup %640  ;;  %551 = vst [vmem:[#allocation10 + $0x8] sm:$0xff] %v639_v28 }
 0x1e1   :  { %553 = vst [vmem:[#allocation10 + $0x18] sm:$0xff] %v641_v29 }
 0x1e6   :  { %v643_v30 = vpop.eup %642 }
 0x1e7   :  { %v645_v31 = vpop.eup %644  ;;  %554 = vst [vmem:[#allocation10 + $0x20] sm:$0xff] %v643_v30 }
 0x1e8   :  { %v647_v32 = vpop.eup %646  ;;  %557 = vst.msk [vmem:[#allocation10 + $0x30] sm:$0xff] %vm556_vm4, %v645_v31 }
 0x1e9   :  { %555 = vst [vmem:[#allocation10 + $0x28] sm:$0xff] %v647_v32 }
 0x1ea   :  { %739 = shalt.err (!%p736_p10)
}
 0x1eb   :  { %567 = dma.vmem_to_hbm [thread:$0]  %s565_s14, 896, %s834_s5, [#allocation4]  }
 0x1ec   :  { %754 = dma.done.wait [#allocation4], 896  }
 0x1ed   :  { %755 = vsyncadd [#allocation4], 4294966400 }
 0x1ee   :  { %571 = vsyncpa [#allocation3], 1 }
 0x1ef   :  { %572 = vsyncpa [#allocation6], 1 }
 0x1f0   :  { %573 = vsyncpa [#allocation9], 1 }
 0x1f1   :  { %574 = vsyncpa [#allocation4], 1 }

</bundles_post_ra>
